<compile_context>
chip_gen: v7x
topology: tpu7x:2x2x1
jax: 0.10.0
libtpu: 0.0.40
codegen_flags: <defaults>
</compile_context>

<pallas_src>
import jax
import jax.numpy as jnp
from jax.experimental import pallas as pl
from jax.experimental.pallas import tpu as pltpu

# ---------------- model hyper-params (small synthetic config) ----------------
B = 2                         # batch
C = 3                         # input channels
H = W = 28                    # input spatial; 28 / 4 = 7 -> 7x7 feature map the module expects
PATCH = 4                     # patch-embed conv kernel = stride
NUM_FEATURES = 8              # img_model.num_features
PROJECTION_DIM = 32           # projection_dim
HP = H // PATCH               # 7
WP = W // PATCH               # 7
HW = HP * WP                  # 49
K_PE = C * PATCH * PATCH      # 48   (im2col contraction dim of the conv)
K_PROJ = NUM_FEATURES * HW    # 392  (Linear in_features)
K_FULL = C * H * W            # 2352 (folded contraction dim: whole image)


# ------------------------------- fused Pallas kernel -------------------------------
def _encoder_kernel(x_ref, w_ref, b_ref, o_ref):
    """out = relu(x @ W_full + b_eff).

    x_ref : (B, C*H*W)            bf16  flattened image (contiguous reshape only)
    w_ref : (C*H*W, D)            bf16  conv + flatten + proj weights, pre-folded
    b_ref : (1, D)                f32   conv bias folded through proj + proj bias
    o_ref : (B, D)                f32
    """
    acc = jnp.dot(x_ref[...], w_ref[...], preferred_element_type=jnp.float32)  # one MXU op
    o_ref[...] = jnp.maximum(acc + b_ref[...], 0.0).astype(o_ref.dtype)        # bias + ReLU (VPU)


# ------------------------------- host-side wrappers -------------------------------
def prepare_params(params):
    """One-time fold of PyTorch-layout parameters into the fused kernel layout."""
    conv_w = params["conv_w"]                                                 # (F, C, P, P)
    conv_b = params["conv_b"]                                                 # (F,)
    proj_w = params["proj_w"].reshape(PROJECTION_DIM, NUM_FEATURES, HP, WP)   # (D, F, i, j)
    proj_b = params["proj_b"]                                                 # (D,)

    # forward_features (stride-4 patch-embed conv) gives feat[b,f,i,j]; PyTorch's
    # x.view(B,-1) flattens channel-major (index = f*49 + i*7 + j).  Fold conv weight,
    # that flatten permutation and the im2col gather into one weight:
    #   W_full[c, 4i+p, 4j+q, d] = sum_f conv_w[f, c, p, q] * proj_w[d, f, i, j]
    w_full = jnp.einsum("fcpq,dfij->cipjqd", conv_w, proj_w)                  # (C,7,4,7,4,D)
    w_full = w_full.reshape(K_FULL, PROJECTION_DIM)                           # (C*H*W, D)

    # Fold the conv bias through the linear projection (removes per-batch in-kernel
    # bias broadcast and any reliance on zero-padding to cancel it).
    b_eff = proj_b + jnp.einsum("dfij,f->d", proj_w, conv_b)                  # (D,)

    return {
        "w_full": w_full.astype(jnp.bfloat16),      # bf16: single-pass MXU, half the DMA
        "b_eff": b_eff.reshape(1, PROJECTION_DIM).astype(jnp.float32),
    }


@jax.jit
def image_encoder_forward(img, prepped):
    """Equivalent of ImageEncoder.forward([img]) with pre-folded params.

    If encoding several images, stack them along the batch axis and make ONE call
    (each extra image is nearly free; dispatch overhead dominates at this size).
    """
    b = img.shape[0]
    # Contiguous reshape only — no im2col, no transpose, no extra HBM buffer.
    x2d = img.reshape(b, K_FULL).astype(jnp.bfloat16)                         # (B, 2352)

    vmem = pl.BlockSpec(memory_space=pltpu.MemorySpace.VMEM)
    cost = pl.CostEstimate(
        flops=2 * b * K_FULL * PROJECTION_DIM,
        transcendentals=0,
        bytes_accessed=2 * (x2d.size + prepped["w_full"].size)
        + 4 * (prepped["b_eff"].size + b * PROJECTION_DIM),
    )
    return pl.pallas_call(
        _encoder_kernel,
        out_shape=jax.ShapeDtypeStruct((b, PROJECTION_DIM), jnp.float32),
        in_specs=[vmem, vmem, vmem],
        out_specs=vmem,
        cost_estimate=cost,
    )(x2d, prepped["w_full"], prepped["b_eff"])


# ----------------------------- deterministic params ---------------------------
def init_params(key):
    k1, k2, k3, k4 = jax.random.split(key, 4)
    return {
        # TODO(synk): an arbitrary timm backbone's forward_features has no generic Pallas
        # translation; it is modeled here as a linear stride-4 patch-embed conv producing
        # the (B, num_features, 7, 7) map the module's `num_features * 7 * 7` flatten needs.
        "conv_w": jax.random.normal(k1, (NUM_FEATURES, C, PATCH, PATCH), jnp.float32) * 0.05,
        "conv_b": jax.random.normal(k2, (NUM_FEATURES,), jnp.float32) * 0.01,
        # projection Linear: weight (D, F*7*7), bias (D,)   (PyTorch nn.Linear layout)
        "proj_w": jax.random.normal(k3, (PROJECTION_DIM, K_PROJ), jnp.float32) * 0.05,
        "proj_b": jax.random.normal(k4, (PROJECTION_DIM,), jnp.float32) * 0.01,
    }


def reference_forward(img, params):
    """Pure-jnp f32 reference matching the PyTorch module semantics (two stages)."""
    b = img.shape[0]
    patches = (
        img.reshape(b, C, HP, PATCH, WP, PATCH)
        .transpose(0, 2, 4, 1, 3, 5)
        .reshape(b * HP * WP, K_PE)
    )
    feat = patches @ params["conv_w"].reshape(NUM_FEATURES, K_PE).T + params["conv_b"]
    feat = feat.reshape(b, HW, NUM_FEATURES).transpose(0, 2, 1).reshape(b, -1)  # x.view(B,-1)
    out = feat @ params["proj_w"].T + params["proj_b"]
    return jnp.maximum(out, 0.0)


if __name__ == "__main__":
    key = jax.random.PRNGKey(0)
    kp, kx = jax.random.split(key)
    params = init_params(kp)
    img = jax.random.normal(kx, (B, C, H, W), jnp.float32)  # img_inputs_lst[0]

    prepped = prepare_params(params)
    out = jax.block_until_ready(image_encoder_forward(img, prepped))

    assert out.shape == (B, PROJECTION_DIM), out.shape
    assert bool(jnp.all(out >= 0.0))  # ReLU output is non-negative
    ref = reference_forward(img, params)
    max_err = float(jnp.max(jnp.abs(out - ref)))
    # Tolerance accounts for the intentional bf16 operands + fold reassociation.
    assert bool(jnp.allclose(out, ref, atol=2e-2, rtol=2e-2)), max_err
    print("KERNEL_OK")
</pallas_src>

<mosaic_0001>
module attributes {stable_mosaic.version = 11 : i64} {
  func.func @_encoder_kernel(%arg0: memref<2x2352xbf16, #tpu.memory_space<vmem>>, %arg1: memref<2352x32xbf16, #tpu.memory_space<vmem>>, %arg2: memref<1x32xf32, #tpu.memory_space<vmem>>, %arg3: memref<2x32xf32, #tpu.memory_space<vmem>>) attributes {dimension_semantics = [], scalar_prefetch = 0 : i64, scratch_operands = 0 : i64, tpu.core_type = #tpu.core_type<tc>} {
    %c0 = arith.constant 0 : index
    %c0_0 = arith.constant 0 : index
    %0 = vector.load %arg0[%c0, %c0_0] : memref<2x2352xbf16, #tpu.memory_space<vmem>>, vector<2x2352xbf16>
    %c0_1 = arith.constant 0 : index
    %c0_2 = arith.constant 0 : index
    %1 = vector.load %arg1[%c0_1, %c0_2] : memref<2352x32xbf16, #tpu.memory_space<vmem>>, vector<2352x32xbf16>
    %cst = arith.constant dense<0.000000e+00> : vector<2x32xf32>
    %2 = tpu.matmul %0, %1, %cst {dimension_numbers = #tpu.dot_dimension_numbers<[1], [0], [0], [1], [0, 0, 1, 1], [], []>} : vector<2x2352xbf16>, vector<2352x32xbf16>, vector<2x32xf32> -> vector<2x32xf32>
    %c0_3 = arith.constant 0 : index
    %c0_4 = arith.constant 0 : index
    %3 = vector.load %arg2[%c0_3, %c0_4] : memref<1x32xf32, #tpu.memory_space<vmem>>, vector<1x32xf32>
    %4 = vector.broadcast %3 : vector<1x32xf32> to vector<2x32xf32>
    %5 = arith.addf %2, %4 : vector<2x32xf32>
    %cst_5 = arith.constant 0.000000e+00 : f32
    %6 = vector.broadcast %cst_5 : f32 to vector<2x32xf32>
    %7 = arith.maximumf %5, %6 : vector<2x32xf32>
    %c0_6 = arith.constant 0 : index
    %c0_7 = arith.constant 0 : index
    %8 = vector.load %arg3[%c0_6, %c0_7] : memref<2x32xf32, #tpu.memory_space<vmem>>, vector<2x32xf32>
    tpu.vector_store %arg3[%c0_6, %c0_7], %7 {strides = array<i32>} : memref<2x32xf32, #tpu.memory_space<vmem>>, vector<2x32xf32>,
    return
  }
}

</mosaic_0001>

<bundles_post_ra>
// kernel: image_encoder_forward.1
= control target key start
LH: loop header
LB: loop body
LE: loop exit
PB: predicated region body
PF: predicated region fallthrough
CT: control target
= control target key end

     0   :  { %v327_v27 = vlaneseq  ;;  %v2304_v35 = vmov 1966171168   ;;  %vm2306_vm0 = vmmov 0   ;;  %s2819_s0 = inlined_call_operand.vmem [shape: bf16[2,2352], index: 0, kind: input, shape index: {}]   ;;  %s2820_s1 = inlined_call_operand.vmem [shape: bf16[2352,32], index: 1, kind: input, shape index: {}]   ;;  %s2821_s2 = inlined_call_operand.vmem [shape: f32[1,32], index: 2, kind: input, shape index: {}]   ;;  %s2822_s3 = inlined_call_operand.hbm [shape: f32[2,32], index: 3, kind: output, shape index: {}]  }
   0x1   :  { %v2131_v0 = vld [vmem:[%s2820_s1 + $0x40] sm:$0xff]   ;;  %v2135_v4 = vld [vmem:[%s2820_s1 + $0x48] sm:$0xff]   ;;  %v2139_v8 = vld [vmem:[%s2820_s1 + $0x50] sm:$0xff]   ;;  %v325_v36 = vunpack.c.l.s4 %v2304_v35 }
   0x2   :  { %v2132_v1 = vld [vmem:[%s2820_s1] sm:$0xff]   ;;  %1915 = vmatprep.subr.bf16.mxu0 %v2131_v0  ;;  %v2136_v5 = vld [vmem:[%s2820_s1 + $0x8] sm:$0xff]   ;;  %v2140_v9 = vld [vmem:[%s2820_s1 + $0x10] sm:$0xff]   ;;  %v328_v32 = vshrl.u32 %v327_v27, 7 }
   0x3   :  { %v2133_v2 = vld [vmem:[%s2820_s1 + $0xc0] sm:$0xff]   ;;  %1916 = vmatpush3.bf16.msra.mxu0 %v2132_v1  ;;  %v2137_v6 = vld [vmem:[%s2820_s1 + $0xc8] sm:$0xff]   ;;  %v2141_v10 = vld [vmem:[%s2820_s1 + $0xd0] sm:$0xff]   ;;  %v326_v39 = vunpack.c.0.s8 %v325_v36 }
   0x4   :  { %v2134_v3 = vld [vmem:[%s2820_s1 + $0x80] sm:$0xff]   ;;  %1937 = vmatprep.subr.bf16.mxu1 %v2133_v2  ;;  %1917 = vmatprep.subr.bf16.mxu0 %v2135_v4  ;;  %v2138_v7 = vld [vmem:[%s2820_s1 + $0x88] sm:$0xff]   ;;  %v2142_v11 = vld [vmem:[%s2820_s1 + $0x90] sm:$0xff]  }
   0x5   :  { %1938 = vmatpush3.bf16.msra.mxu1 %v2134_v3  ;;  %v2143_v12 = vld [vmem:[%s2820_s1 + $0x58] sm:$0xff]   ;;  %v2147_v16 = vld [vmem:[%s2820_s1 + $0x60] sm:$0xff]   ;;  %v2151_v20 = vld [vmem:[%s2820_s1 + $0x68] sm:$0xff]   ;;  %v2433_v41 = vsub.s32 %v326_v39, %v328_v32 }
   0x6   :  { %1939 = vmatprep.subr.bf16.mxu1 %v2137_v6  ;;  %v2144_v13 = vld [vmem:[%s2820_s1 + $0x18] sm:$0xff]   ;;  %v2148_v17 = vld [vmem:[%s2820_s1 + $0x20] sm:$0xff]   ;;  %v2152_v21 = vld [vmem:[%s2820_s1 + $0x28] sm:$0xff]  }
   0x7   :  { %1918 = vmatpush3.bf16.msra.mxu0 %v2136_v5  ;;  %v2145_v14 = vld [vmem:[%s2820_s1 + $0xd8] sm:$0xff]   ;;  %v2149_v18 = vld [vmem:[%s2820_s1 + $0xe0] sm:$0xff]   ;;  %v2153_v22 = vld [vmem:[%s2820_s1 + $0xe8] sm:$0xff]  }
   0x8   :  { %1919 = vmatprep.subr.bf16.mxu0 %v2139_v8  ;;  %v2146_v15 = vld [vmem:[%s2820_s1 + $0x98] sm:$0xff]   ;;  %v2150_v19 = vld [vmem:[%s2820_s1 + $0xa0] sm:$0xff]   ;;  %v2154_v23 = vld [vmem:[%s2820_s1 + $0xa8] sm:$0xff]  }
   0x9   :  { %1940 = vmatpush3.bf16.msra.mxu1 %v2138_v7  ;;  %v2155_v24 = vld [vmem:[%s2820_s1 + $0x70] sm:$0xff]   ;;  %v2159_v29 = vld [vmem:[%s2820_s1 + $0x78] sm:$0xff]   ;;  %v16_v33 = vld [vmem:[%s2819_s0] sm:$0xff] }
   0xa   :  { %1941 = vmatprep.subr.bf16.mxu1 %v2141_v10  ;;  %v2156_v25 = vld [vmem:[%s2820_s1 + $0x30] sm:$0xff]   ;;  %v2160_v30 = vld [vmem:[%s2820_s1 + $0x38] sm:$0xff]   ;;  %v2164_v37 = vld [vmem:[%s2820_s1 + $0x140] sm:$0xff]   ;;  %v323_v38 = vcombine.high %v16_v33, %v16_v33  ;;  %v330_v42 = vrot.slane %v16_v33, %v2433_v41 }
   0xb   :  { %1920 = vmatpush3.bf16.msra.mxu0 %v2140_v9  ;;  %v2157_v26 = vld [vmem:[%s2820_s1 + $0xf0] sm:$0xff]   ;;  %v2161_v31 = vld [vmem:[%s2820_s1 + $0xf8] sm:$0xff]   ;;  %v2166_v40 = vld [vmem:[%s2820_s1 + $0x1c0] sm:$0xff]  }
   0xc   :  { %1921 = vmatprep.subr.bf16.mxu0 %v2143_v12  ;;  %v2158_v28 = vld [vmem:[%s2820_s1 + $0xb0] sm:$0xff]   ;;  %v2163_v34 = vld [vmem:[%s2820_s1 + $0xb8] sm:$0xff]   ;;  %v2437_v43 = vrot.slane %v323_v38, %v2433_v41  ;;  %v338_v44 = vcombine.high %v330_v42, %v330_v42  ;;  %v346_v45 = vrot.slane %v330_v42, %v2433_v41  ;;  %v2165_v48 = vld [vmem:[%s2820_s1 + $0x100] sm:$0xff]  }
   0xd   :  { %1942 = vmatpush3.bf16.msra.mxu1 %v2142_v11  ;;  %v2168_v51 = vld [vmem:[%s2820_s1 + $0x148] sm:$0xff]   ;;  %v2167_v53 = vld [vmem:[%s2820_s1 + $0x180] sm:$0xff]   ;;  %v2172_v57 = vld [vmem:[%s2820_s1 + $0x150] sm:$0xff]  }
   0xe   :  { %1943 = vmatprep.subr.bf16.mxu1 %v2145_v14  ;;  %v339_v46 = vcombine.high %v2437_v43, %v2437_v43  ;;  %v360_v47 = vrot.slane %v338_v44, %v2433_v41  ;;  %v368_v50 = vcombine.high %v346_v45, %v346_v45  ;;  %v2170_v54 = vld [vmem:[%s2820_s1 + $0x1c8] sm:$0xff]   ;;  %v2174_v59 = vld [vmem:[%s2820_s1 + $0x1d0] sm:$0xff]   ;;  %v2176_v61 = vld [vmem:[%s2820_s1 + $0x158] sm:$0xff]  }
   0xf   :  { %1922 = vmatpush3.bf16.msra.mxu0 %v2144_v13  ;;  %v2169_v56 = vld [vmem:[%s2820_s1 + $0x108] sm:$0xff]   ;;  %v2173_v60 = vld [vmem:[%s2820_s1 + $0x110] sm:$0xff]   ;;  %v2178_v63 = vld [vmem:[%s2820_s1 + $0x1d8] sm:$0xff]  }
  0x10   :  { %1923 = vmatprep.subr.bf16.mxu0 %v2147_v16  ;;  %v367_v49 = vrot.slane %v339_v46, %v2433_v41  ;;  %1380 = vmatprep.mubr.bf16.mxu0 %v360_v47  ;;  %v370_v52 = vcombine.high %v360_v47, %v360_v47  ;;  %v2171_v58 = vld [vmem:[%s2820_s1 + $0x188] sm:$0xff]   ;;  %v2175_v62 = vld [vmem:[%s2820_s1 + $0x190] sm:$0xff]   ;;  %v2177_v0 = vld [vmem:[%s2820_s1 + $0x118] sm:$0xff]  }
  0x11   :  { %1944 = vmatpush3.bf16.msra.mxu1 %v2146_v15  ;;  %v2180_v1 = vld [vmem:[%s2820_s1 + $0x160] sm:$0xff]   ;;  %v2179_v2 = vld [vmem:[%s2820_s1 + $0x198] sm:$0xff]   ;;  %v2184_v5 = vld [vmem:[%s2820_s1 + $0x168] sm:$0xff]  }
  0x12   :  { %1945 = vmatprep.subr.bf16.mxu1 %v2149_v18  ;;  %v371_v55 = vcombine.high %v367_v49, %v367_v49  ;;  %1420 = vmatprep.mubr.bf16.mxu1 %v370_v52  ;;  %v2182_v3 = vld [vmem:[%s2820_s1 + $0x1e0] sm:$0xff]   ;;  %v2186_v7 = vld [vmem:[%s2820_s1 + $0x1e8] sm:$0xff]   ;;  %v2188_v9 = vld [vmem:[%s2820_s1 + $0x170] sm:$0xff]  }
  0x13   :  { %1924 = vmatpush3.bf16.msra.mxu0 %v2148_v17  ;;  %v2181_v4 = vld [vmem:[%s2820_s1 + $0x120] sm:$0xff]   ;;  %v2185_v8 = vld [vmem:[%s2820_s1 + $0x128] sm:$0xff]   ;;  %v2190_v11 = vld [vmem:[%s2820_s1 + $0x1f0] sm:$0xff]   ;;  %v353_v17 = vrot.slane %v2437_v43, %v2433_v41 }
  0x14   :  { %1925 = vmatprep.subr.bf16.mxu0 %v2151_v20  ;;  %v2183_v6 = vld [vmem:[%s2820_s1 + $0x1a0] sm:$0xff]   ;;  %v2187_v10 = vld [vmem:[%s2820_s1 + $0x1a8] sm:$0xff]   ;;  %v2189_v12 = vld [vmem:[%s2820_s1 + $0x130] sm:$0xff]  }
  0x15   :  { %1946 = vmatpush3.bf16.msra.mxu1 %v2150_v19  ;;  %v2192_v13 = vld [vmem:[%s2820_s1 + $0x178] sm:$0xff]   ;;  %v2191_v14 = vld [vmem:[%s2820_s1 + $0x1b0] sm:$0xff]   ;;  %v2196_v18 = vld [vmem:[%s2820_s1 + $0x240] sm:$0xff]  }
  0x16   :  { %1947 = vmatprep.subr.bf16.mxu1 %v2153_v22  ;;  %v2194_v15 = vld [vmem:[%s2820_s1 + $0x1f8] sm:$0xff]   ;;  %v2198_v20 = vld [vmem:[%s2820_s1 + $0x2c0] sm:$0xff]   ;;  %v369_v22 = vcombine.high %v353_v17, %v353_v17  ;;  %v2204_v27 = vld [vmem:[%s2820_s1 + $0x250] sm:$0xff]  }
  0x17   :  { %1926 = vmatpush3.bf16.msra.mxu0 %v2152_v21  ;;  %v2193_v16 = vld [vmem:[%s2820_s1 + $0x138] sm:$0xff]   ;;  %v2197_v21 = vld [vmem:[%s2820_s1 + $0x200] sm:$0xff]   ;;  %v2207_v32 = vld [vmem:[%s2820_s1 + $0x290] sm:$0xff]  }
  0x18   :  { %1927 = vmatprep.subr.bf16.mxu0 %v2155_v24  ;;  %v2195_v19 = vld [vmem:[%s2820_s1 + $0x1b8] sm:$0xff]   ;;  %v2199_v24 = vld [vmem:[%s2820_s1 + $0x280] sm:$0xff]   ;;  %v2216_v39 = vld [vmem:[%s2820_s1 + $0x268] sm:$0xff]  }
  0x19   :  { %1948 = vmatpush3.bf16.msra.mxu1 %v2154_v23  ;;  %v2200_v23 = vld [vmem:[%s2820_s1 + $0x248] sm:$0xff]   ;;  %v2210_v33 = vld [vmem:[%s2820_s1 + $0x2d8] sm:$0xff]   ;;  %v2212_v35 = vld [vmem:[%s2820_s1 + $0x260] sm:$0xff]  }
  0x1a   :  { %1949 = vmatprep.subr.bf16.mxu1 %v2157_v26  ;;  %v2201_v26 = vld [vmem:[%s2820_s1 + $0x208] sm:$0xff]   ;;  %v2211_v36 = vld [vmem:[%s2820_s1 + $0x298] sm:$0xff]   ;;  %v2213_v38 = vld [vmem:[%s2820_s1 + $0x220] sm:$0xff]  }
  0x1b   :  { %1928 = vmatpush3.bf16.msra.mxu0 %v2156_v25  ;;  %v2202_v25 = vld [vmem:[%s2820_s1 + $0x2c8] sm:$0xff]   ;;  %v2220_v44 = vld [vmem:[%s2820_s1 + $0x270] sm:$0xff]  }
  0x1c   :  { %1929 = vmatprep.subr.bf16.mxu0 %v2159_v29  ;;  %v2206_v29 = vld [vmem:[%s2820_s1 + $0x2d0] sm:$0xff]   ;;  %v2218_v42 = vld [vmem:[%s2820_s1 + $0x2e8] sm:$0xff]  }
  0x1d   :  { %1950 = vmatpush3.bf16.msra.mxu1 %v2158_v28  ;;  %v2203_v28 = vld [vmem:[%s2820_s1 + $0x288] sm:$0xff]  }
  0x1e   :  { %1951 = vmatprep.subr.bf16.mxu1 %v2161_v31  ;;  %v2208_v31 = vld [vmem:[%s2820_s1 + $0x258] sm:$0xff]   ;;  %v2217_v43 = vld [vmem:[%s2820_s1 + $0x228] sm:$0xff]  }
  0x1f   :  { %1930 = vmatpush3.bf16.msra.mxu0 %v2160_v30  ;;  %v2205_v30 = vld [vmem:[%s2820_s1 + $0x210] sm:$0xff]   ;;  %v2219_v46 = vld [vmem:[%s2820_s1 + $0x2a8] sm:$0xff]  }
  0x20   :  { %1959 = vmatprep.subr.bf16.mxu0 %v2164_v37  ;;  %v2214_v37 = vld [vmem:[%s2820_s1 + $0x2e0] sm:$0xff]  }
  0x21   :  { %1952 = vmatpush3.bf16.msra.mxu1 %v2163_v34  ;;  %v2209_v34 = vld [vmem:[%s2820_s1 + $0x218] sm:$0xff]  }
  0x22   :  { %1981 = vmatprep.subr.bf16.mxu1 %v2166_v40  ;;  %1381 = vmatmul.mubr.bf16.vlgmr.msra.gmra.mrb[0].mxu0 %v346_v45  ;;  %v2215_v40 = vld [vmem:[%s2820_s1 + $0x2a0] sm:$0xff]   ;;  %v17_v45 = vld [vmem:[%s2819_s0 + $0x8] sm:$0xff] }
  0x23   :  { %1960 = vmatpush3.bf16.msra.mxu0 %v2165_v48  ;;  %1460 = vmatprep.mubr.bf16.mxu0 %v367_v49  ;;  %v379_v47 = vrot.slane %v17_v45, %v2433_v41  ;;  %v372_v48 = vcombine.high %v17_v45, %v17_v45  ;;  %v2222_v49 = vld [vmem:[%s2820_s1 + $0x2f0] sm:$0xff]   ;;  %v2267_v45 = vld [vmem:[%s2820_s1 + $0x458] sm:$0xff]  }
  0x24   :  { %1421 = vmatmul.mubr.bf16.vlgmr.msra.gmra.mrb[0].mxu1 %v368_v50  ;;  %1961 = vmatprep.subr.bf16.mxu0 %v2168_v51  ;;  %v2221_v50 = vld [vmem:[%s2820_s1 + $0x230] sm:$0xff]  }
  0x25   :  { %1982 = vmatpush3.bf16.msra.mxu1 %v2167_v53  ;;  %1500 = vmatprep.mubr.bf16.mxu1 %v371_v55  ;;  %v387_v51 = vcombine.high %v379_v47, %v379_v47  ;;  %v2622_v52 = vrot.slane %v372_v48, %v2433_v41  ;;  %v2224_v53 = vld [vmem:[%s2820_s1 + $0x278] sm:$0xff]   ;;  %v2279_v48 = vld [vmem:[%s2820_s1 + $0x490] sm:$0xff]  }
  0x26   :  { %1983 = vmatprep.subr.bf16.mxu1 %v2170_v54  ;;  %v2223_v54 = vld [vmem:[%s2820_s1 + $0x2b0] sm:$0xff]  }
  0x27   :  { %1962 = vmatpush3.bf16.msra.mxu0 %v2169_v56  ;;  %v409_v55 = vrot.slane %v387_v51, %v2433_v41  ;;  %v388_v56 = vcombine.high %v2622_v52, %v2622_v52 }
  0x28   :  { %1963 = vmatprep.subr.bf16.mxu0 %v2172_v57  ;;  %v2226_v57 = vld [vmem:[%s2820_s1 + $0x2f8] sm:$0xff]  }
  0x29   :  { %1984 = vmatpush3.bf16.msra.mxu1 %v2171_v58  ;;  %v2225_v58 = vld [vmem:[%s2820_s1 + $0x238] sm:$0xff]  }
  0x2a   :  { %1985 = vmatprep.subr.bf16.mxu1 %v2174_v59  ;;  %v419_v59 = vcombine.high %v409_v55, %v409_v55 }
  0x2b   :  { %1964 = vmatpush3.bf16.msra.mxu0 %v2173_v60  ;;  %v395_v60 = vrot.slane %v379_v47, %v2433_v41 }
  0x2c   :  { %1965 = vmatprep.subr.bf16.mxu0 %v2176_v61  ;;  %v2228_v61 = vld [vmem:[%s2820_s1 + $0x340] sm:$0xff]  }
  0x2d   :  { %1986 = vmatpush3.bf16.msra.mxu1 %v2175_v62  ;;  %v2227_v62 = vld [vmem:[%s2820_s1 + $0x2b8] sm:$0xff]  }
  0x2e   :  { %1987 = vmatprep.subr.bf16.mxu1 %v2178_v63  ;;  %v416_v63 = vrot.slane %v388_v56, %v2433_v41 }
  0x2f   :  { %1966 = vmatpush3.bf16.msra.mxu0 %v2177_v0  ;;  %v2230_v0 = vld [vmem:[%s2820_s1 + $0x3c0] sm:$0xff]  }
  0x30   :  { %1967 = vmatprep.subr.bf16.mxu0 %v2180_v1  ;;  %v2229_v1 = vld [vmem:[%s2820_s1 + $0x300] sm:$0xff]  }
  0x31   :  { %1988 = vmatpush3.bf16.msra.mxu1 %v2179_v2  ;;  %v417_v2 = vcombine.high %v395_v60, %v395_v60 }
  0x32   :  { %1989 = vmatprep.subr.bf16.mxu1 %v2182_v3  ;;  %v2232_v3 = vld [vmem:[%s2820_s1 + $0x348] sm:$0xff]  }
  0x33   :  { %1968 = vmatpush3.bf16.msra.mxu0 %v2181_v4  ;;  %v2231_v4 = vld [vmem:[%s2820_s1 + $0x380] sm:$0xff]  }
  0x34   :  { %1969 = vmatprep.subr.bf16.mxu0 %v2184_v5  ;;  %v420_v5 = vcombine.high %v416_v63, %v416_v63 }
  0x35   :  { %1990 = vmatpush3.bf16.msra.mxu1 %v2183_v6  ;;  %v2234_v6 = vld [vmem:[%s2820_s1 + $0x3c8] sm:$0xff]  }
  0x36   :  { %1991 = vmatprep.subr.bf16.mxu1 %v2186_v7  ;;  %v2233_v7 = vld [vmem:[%s2820_s1 + $0x308] sm:$0xff]  }
  0x37   :  { %1970 = vmatpush3.bf16.msra.mxu0 %v2185_v8  ;;  %v2236_v8 = vld [vmem:[%s2820_s1 + $0x350] sm:$0xff]  }
  0x38   :  { %1971 = vmatprep.subr.bf16.mxu0 %v2188_v9  ;;  %v2235_v9 = vld [vmem:[%s2820_s1 + $0x388] sm:$0xff]  }
  0x39   :  { %1992 = vmatpush3.bf16.msra.mxu1 %v2187_v10  ;;  %v2238_v10 = vld [vmem:[%s2820_s1 + $0x3d0] sm:$0xff]  }
  0x3a   :  { %1993 = vmatprep.subr.bf16.mxu1 %v2190_v11  ;;  %v2237_v11 = vld [vmem:[%s2820_s1 + $0x310] sm:$0xff]  }
  0x3b   :  { %1972 = vmatpush3.bf16.msra.mxu0 %v2189_v12  ;;  %v2240_v12 = vld [vmem:[%s2820_s1 + $0x358] sm:$0xff]  }
  0x3c   :  { %1973 = vmatprep.subr.bf16.mxu0 %v2192_v13  ;;  %v2239_v13 = vld [vmem:[%s2820_s1 + $0x390] sm:$0xff]  }
  0x3d   :  { %1994 = vmatpush3.bf16.msra.mxu1 %v2191_v14  ;;  %v2242_v14 = vld [vmem:[%s2820_s1 + $0x3d8] sm:$0xff]  }
  0x3e   :  { %1995 = vmatprep.subr.bf16.mxu1 %v2194_v15  ;;  %v2241_v15 = vld [vmem:[%s2820_s1 + $0x318] sm:$0xff]  }
  0x3f   :  { %1974 = vmatpush3.bf16.msra.mxu0 %v2193_v16  ;;  %v2244_v16 = vld [vmem:[%s2820_s1 + $0x360] sm:$0xff]  }
  0x40   :  { %2003 = vmatprep.subr.bf16.mxu0 %v2196_v18  ;;  %v2246_v18 = vld [vmem:[%s2820_s1 + $0x3e0] sm:$0xff]  }
  0x41   :  { %1996 = vmatpush3.bf16.msra.mxu1 %v2195_v19  ;;  %v2245_v19 = vld [vmem:[%s2820_s1 + $0x320] sm:$0xff]  }
  0x42   :  { %1461 = vmatmul.mubr.bf16.vlgmr.msra.gmra.mrb[4].mxu0 %v353_v17  ;;  %2025 = vmatprep.subr.bf16.mxu1 %v2198_v20  ;;  %v2243_v17 = vld [vmem:[%s2820_s1 + $0x398] sm:$0xff]   ;;  %v2248_v20 = vld [vmem:[%s2820_s1 + $0x368] sm:$0xff]  }
  0x43   :  { %2004 = vmatpush3.bf16.msra.mxu0 %v2197_v21  ;;  %1540 = vmatprep.mubr.bf16.mxu0 %v409_v55  ;;  %v2247_v21 = vld [vmem:[%s2820_s1 + $0x3a0] sm:$0xff]  }
  0x44   :  { %1501 = vmatmul.mubr.bf16.vlgmr.msra.gmra.mrb[4].mxu1 %v369_v22  ;;  %2005 = vmatprep.subr.bf16.mxu0 %v2200_v23  ;;  %v2250_v22 = vld [vmem:[%s2820_s1 + $0x3e8] sm:$0xff]  }
  0x45   :  { %2026 = vmatpush3.bf16.msra.mxu1 %v2199_v24  ;;  %1580 = vmatprep.mubr.bf16.mxu1 %v419_v59  ;;  %v2249_v23 = vld [vmem:[%s2820_s1 + $0x328] sm:$0xff]   ;;  %v2252_v24 = vld [vmem:[%s2820_s1 + $0x370] sm:$0xff]  }
  0x46   :  { %2027 = vmatprep.subr.bf16.mxu1 %v2202_v25  ;;  %v2251_v25 = vld [vmem:[%s2820_s1 + $0x3a8] sm:$0xff]  }
  0x47   :  { %2006 = vmatpush3.bf16.msra.mxu0 %v2201_v26  ;;  %v2254_v26 = vld [vmem:[%s2820_s1 + $0x3f0] sm:$0xff]  }
  0x48   :  { %2007 = vmatprep.subr.bf16.mxu0 %v2204_v27  ;;  %v2253_v27 = vld [vmem:[%s2820_s1 + $0x330] sm:$0xff]  }
  0x49   :  { %2028 = vmatpush3.bf16.msra.mxu1 %v2203_v28  ;;  %v2256_v28 = vld [vmem:[%s2820_s1 + $0x378] sm:$0xff]  }
  0x4a   :  { %2029 = vmatprep.subr.bf16.mxu1 %v2206_v29  ;;  %v2255_v29 = vld [vmem:[%s2820_s1 + $0x3b0] sm:$0xff]  }
  0x4b   :  { %2008 = vmatpush3.bf16.msra.mxu0 %v2205_v30  ;;  %v2258_v30 = vld [vmem:[%s2820_s1 + $0x3f8] sm:$0xff]  }
  0x4c   :  { %2009 = vmatprep.subr.bf16.mxu0 %v2208_v31  ;;  %v2257_v31 = vld [vmem:[%s2820_s1 + $0x338] sm:$0xff]  }
  0x4d   :  { %2030 = vmatpush3.bf16.msra.mxu1 %v2207_v32  ;;  %v402_v32 = vrot.slane %v2622_v52, %v2433_v41 }
  0x4e   :  { %2031 = vmatprep.subr.bf16.mxu1 %v2210_v33  ;;  %v2261_v33 = vld [vmem:[%s2820_s1 + $0x440] sm:$0xff]  }
  0x4f   :  { %2010 = vmatpush3.bf16.msra.mxu0 %v2209_v34  ;;  %v2260_v34 = vld [vmem:[%s2820_s1 + $0x3b8] sm:$0xff]  }
  0x50   :  { %2011 = vmatprep.subr.bf16.mxu0 %v2212_v35  ;;  %v2262_v35 = vld [vmem:[%s2820_s1 + $0x400] sm:$0xff]  }
  0x51   :  { %2032 = vmatpush3.bf16.msra.mxu1 %v2211_v36  ;;  %v418_v36 = vcombine.high %v402_v32, %v402_v32 }
  0x52   :  { %2033 = vmatprep.subr.bf16.mxu1 %v2214_v37  ;;  %v2263_v37 = vld [vmem:[%s2820_s1 + $0x448] sm:$0xff]  }
  0x53   :  { %2012 = vmatpush3.bf16.msra.mxu0 %v2213_v38  ;;  %v2305_v38 = vmov 0.0  }
  0x54   :  { %2013 = vmatprep.subr.bf16.mxu0 %v2216_v39  ;;  %v2273_v39 = vld [vmem:[%s2820_s1 + $0x480] sm:$0xff]  }
  0x55   :  { %2034 = vmatpush3.bf16.msra.mxu1 %v2215_v40  ;;  %v2264_v40 = vld [vmem:[%s2820_s1 + $0x408] sm:$0xff]  }
  0x56   :  { %2035 = vmatprep.subr.bf16.mxu1 %v2218_v42  ;;  %v2265_v42 = vld [vmem:[%s2820_s1 + $0x450] sm:$0xff]  }
  0x57   :  { %2014 = vmatpush3.bf16.msra.mxu0 %v2217_v43  ;;  %v2276_v43 = vld [vmem:[%s2820_s1 + $0x488] sm:$0xff]  }
  0x58   :  { %2015 = vmatprep.subr.bf16.mxu0 %v2220_v44  ;;  %v2266_v44 = vld [vmem:[%s2820_s1 + $0x410] sm:$0xff]  }
  0x59   :  { %2036 = vmatpush3.bf16.msra.mxu1 %v2219_v46  ;;  %v1766_v46 = vld.sshfl [vmem:[%s2819_s0 + $0x10] sm:$0x13 pattern:$0x75316420] }
  0x5a   :  { %2037 = vmatprep.subr.bf16.mxu1 %v2222_v49  ;;  %v428_v47 = vcombine.high %v1766_v46, %v1766_v46  ;;  %v435_v49 = vrot.slane %v1766_v46, %v2433_v41 }
  0x5b   :  { %2016 = vmatpush3.bf16.msra.mxu0 %v2221_v50 }
  0x5c   :  { %2017 = vmatprep.subr.bf16.mxu0 %v2224_v53 }
  0x5d   :  { %2038 = vmatpush3.bf16.msra.mxu1 %v2223_v54 }
  0x5e   :  { %2039 = vmatprep.subr.bf16.mxu1 %v2226_v57 }
  0x5f   :  { %2018 = vmatpush3.bf16.msra.mxu0 %v2225_v58 }
  0x60   :  { %2047 = vmatprep.subr.bf16.mxu0 %v2228_v61 }
  0x61   :  { %2040 = vmatpush3.bf16.msra.mxu1 %v2227_v62 }
  0x62   :  { %1541 = vmatmul.mubr.bf16.vlgmr.msra.gmra.mrb[8].mxu0 %v395_v60  ;;  %2069 = vmatprep.subr.bf16.mxu1 %v2230_v0 }
  0x63   :  { %2048 = vmatpush3.bf16.msra.mxu0 %v2229_v1  ;;  %1620 = vmatprep.mubr.bf16.mxu0 %v416_v63 }
  0x64   :  { %1581 = vmatmul.mubr.bf16.vlgmr.msra.gmra.mrb[8].mxu1 %v417_v2  ;;  %2049 = vmatprep.subr.bf16.mxu0 %v2232_v3 }
  0x65   :  { %2070 = vmatpush3.bf16.msra.mxu1 %v2231_v4  ;;  %1660 = vmatprep.mubr.bf16.mxu1 %v420_v5 }
  0x66   :  { %2071 = vmatprep.subr.bf16.mxu1 %v2234_v6 }
  0x67   :  { %2050 = vmatpush3.bf16.msra.mxu0 %v2233_v7 }
  0x68   :  { %2051 = vmatprep.subr.bf16.mxu0 %v2236_v8 }
  0x69   :  { %2072 = vmatpush3.bf16.msra.mxu1 %v2235_v9 }
  0x6a   :  { %2073 = vmatprep.subr.bf16.mxu1 %v2238_v10 }
  0x6b   :  { %2052 = vmatpush3.bf16.msra.mxu0 %v2237_v11 }
  0x6c   :  { %2053 = vmatprep.subr.bf16.mxu0 %v2240_v12 }
  0x6d   :  { %2074 = vmatpush3.bf16.msra.mxu1 %v2239_v13 }
  0x6e   :  { %2075 = vmatprep.subr.bf16.mxu1 %v2242_v14 }
  0x6f   :  { %2054 = vmatpush3.bf16.msra.mxu0 %v2241_v15 }
  0x70   :  { %2055 = vmatprep.subr.bf16.mxu0 %v2244_v16 }
  0x71   :  { %2076 = vmatpush3.bf16.msra.mxu1 %v2243_v17 }
  0x72   :  { %2077 = vmatprep.subr.bf16.mxu1 %v2246_v18 }
  0x73   :  { %2056 = vmatpush3.bf16.msra.mxu0 %v2245_v19 }
  0x74   :  { %2057 = vmatprep.subr.bf16.mxu0 %v2248_v20 }
  0x75   :  { %2078 = vmatpush3.bf16.msra.mxu1 %v2247_v21 }
  0x76   :  { %2079 = vmatprep.subr.bf16.mxu1 %v2250_v22 }
  0x77   :  { %2058 = vmatpush3.bf16.msra.mxu0 %v2249_v23 }
  0x78   :  { %2059 = vmatprep.subr.bf16.mxu0 %v2252_v24 }
  0x79   :  { %2080 = vmatpush3.bf16.msra.mxu1 %v2251_v25 }
  0x7a   :  { %2081 = vmatprep.subr.bf16.mxu1 %v2254_v26 }
  0x7b   :  { %2060 = vmatpush3.bf16.msra.mxu0 %v2253_v27 }
  0x7c   :  { %2061 = vmatprep.subr.bf16.mxu0 %v2256_v28 }
  0x7d   :  { %2082 = vmatpush3.bf16.msra.mxu1 %v2255_v29 }
  0x7e   :  { %2083 = vmatprep.subr.bf16.mxu1 %v2258_v30 }
  0x7f   :  { %2062 = vmatpush3.bf16.msra.mxu0 %v2257_v31 }
  0x80   :  { %2091 = vmatprep.subr.bf16.mxu0 %v2261_v33 }
  0x81   :  { %2084 = vmatpush3.bf16.msra.mxu1 %v2260_v34 }
  0x82   :  { %1621 = vmatmul.mubr.bf16.vlgmr.msra.gmra.mrb[12].mxu0 %v402_v32  ;;  %2117 = vmatprep.subr.bf16.mxu1 %v2305_v38 }
  0x83   :  { %2092 = vmatpush3.bf16.msra.mxu0 %v2262_v35 }
  0x84   :  { %1661 = vmatmul.mubr.bf16.vlgmr.msra.gmra.mrb[12].mxu1 %v418_v36  ;;  %2093 = vmatprep.subr.bf16.mxu0 %v2263_v37 }
  0x85   :  { %2118 = vmatpush3.bf16.msra.mxu1 %v2273_v39  ;;  %2123 = vmatprep.mubr.msk.bf16.mxu1 %vm2306_vm0, %v2305_v38 }
  0x86   :  { %2119 = vmatprep.subr.bf16.mxu1 %v2305_v38 }
  0x87   :  { %2094 = vmatpush3.bf16.msra.mxu0 %v2264_v40 }
  0x88   :  { %2095 = vmatprep.subr.bf16.mxu0 %v2265_v42 }
  0x89   :  { %2120 = vmatpush3.bf16.msra.mxu1 %v2276_v43 }
  0x8a   :  { %8 = vsyncpa [#allocation3], 0  ;;  %2121 = vmatprep.subr.bf16.mxu1 %v2305_v38  ;;  %v2268_v50 = vld [vmem:[%s2820_s1 + $0x418] sm:$0xff]   ;;  %v442_v51 = vrot.slane %v428_v47, %v2433_v41  ;;  %v2269_v52 = vld [vmem:[%s2820_s1 + $0x460] sm:$0xff]   ;;  %v443_v53 = vcombine.high %v435_v49, %v435_v49  ;;  %vm1344_vm1 = vcmask 392192   ;;  %vm1749_vm2 = vcmask 254976  }
  0x8b   :  { %2096 = vmatpush3.bf16.msra.mxu0 %v2266_v44  ;;  %v2270_v54 = vld [vmem:[%s2820_s1 + $0x420] sm:$0xff]   ;;  %v2271_v55 = vld [vmem:[%s2820_s1 + $0x468] sm:$0xff]   ;;  %v2274_v56 = vld [vmem:[%s2820_s1 + $0x470] sm:$0xff]  }
  0x8c   :  { %2097 = vmatprep.subr.bf16.mxu0 %v2267_v45  ;;  %1700 = vmatprep.mubr.bf16.mxu0 %v442_v51  ;;  %v2272_v41 = vld [vmem:[%s2820_s1 + $0x428] sm:$0xff]   ;;  %v2275_v57 = vld [vmem:[%s2820_s1 + $0x430] sm:$0xff]   ;;  %v2277_v58 = vld [vmem:[%s2820_s1 + $0x478] sm:$0xff]  }
  0x8d   :  { %2122 = vmatpush3.bf16.msra.mxu1 %v2279_v48  ;;  %v2278_v59 = vld [vmem:[%s2820_s1 + $0x438] sm:$0xff]   ;;  %v1765_v61 = vld [vmem:[%s2821_s2] ss:$0 sm:$0xff]  ;;  %s2307_s1 = smov [#allocation2]  }
  0x8e   :  { %s1757_s2 = sshll.u32 %s2307_s1, 4  ;;  %s1758_s2 = int_to_ptr.vmem [resolvable:$true] %s1757_s2 }
  0x8f   :  { %2098 = vmatpush3.bf16.msra.mxu0 %v2268_v50  ;;  %s2280_s16 = scalar_lea.vmem %s1758_s2, 32  ;;  %p2285_p1 = scmp.lt.s32.totalorder %s1758_s2, %s1758_s2 }
  0x90   :  { %2099 = vmatprep.subr.bf16.mxu0 %v2269_v52  ;;  %2124 = vmatmul.mubr.msk.bf16.vlgmr.msra.gmra.mrb[16].mxu1 %vm1344_vm1, %v443_v53  ;;  %p2281_p0 = scmp.ne.s32.totalorder %s1758_s2, %s2280_s16  ;;  %p2286_p2 = scmp.lt.s32.totalorder %s2280_s16, %s2280_s16 }
  0x92   :  { %p2287_p3 = por %p2286_p2, %p2285_p1 }
  0x93   :  { %2100 = vmatpush3.bf16.msra.mxu0 %v2270_v54 }
  0x94   :  { %2101 = vmatprep.subr.bf16.mxu0 %v2271_v55  ;;  %p2288_p4 = pnand %p2287_p3, %p2281_p0 }
  0x97   :  { %2102 = vmatpush3.bf16.msra.mxu0 %v2272_v41 }
  0x98   :  { %2103 = vmatprep.subr.bf16.mxu0 %v2274_v56 }
  0x9b   :  { %2104 = vmatpush3.bf16.msra.mxu0 %v2275_v57 }
  0x9c   :  { %2105 = vmatprep.subr.bf16.mxu0 %v2277_v58 }
  0x9f   :  { %2106 = vmatpush3.bf16.msra.mxu0 %v2278_v59 }
  0xa2   :  { %1701 = vmatmul.mubr.bf16.vlgmr.msra.gmra.mrb[16].mxu0 %v435_v49 }
  0xf5   :  { %v1931_v60 = vpop.f32.mrb[0].mxu0 }
  0xf6   :  { %v1932_v62 = vpop.f32.mrb[1].mxu0 }
  0xf7   :  { %v1933_v63 = vadd.f32 %v1932_v62, %v1931_v60  ;;  %v1934_v0 = vpop.f32.mrb[2].mxu0  ;;  %v1953_v1 = vpop.f32.mrb[0].mxu1 }
  0xf8   :  { %v1935_v2 = vpop.f32.mrb[3].mxu0  ;;  %v1954_v3 = vpop.f32.mrb[1].mxu1 }
  0xf9   :  { %v1383_v4 = vadd.f32 %v1933_v63, %v1765_v61  ;;  %v1955_v5 = vadd.f32 %v1954_v3, %v1953_v1  ;;  %v1956_v6 = vpop.f32.mrb[2].mxu1 }
  0xfa   :  { %v1957_v7 = vpop.f32.mrb[3].mxu1 }
  0xfb   :  { %v1423_v8 = vadd.f32 %v1955_v5, %v1383_v4 }
 0x115   :  { %v1975_v9 = vpop.f32.mrb[4].mxu0 }
 0x116   :  { %v1976_v10 = vpop.f32.mrb[5].mxu0 }
 0x117   :  { %v1977_v11 = vadd.f32 %v1976_v10, %v1975_v9  ;;  %v1978_v12 = vpop.f32.mrb[6].mxu0  ;;  %v1997_v13 = vpop.f32.mrb[4].mxu1 }
 0x118   :  { %v1979_v14 = vpop.f32.mrb[7].mxu0  ;;  %v1998_v15 = vpop.f32.mrb[5].mxu1 }
 0x119   :  { %v1463_v16 = vadd.f32 %v1977_v11, %v1423_v8  ;;  %v1999_v17 = vadd.f32 %v1998_v15, %v1997_v13  ;;  %v2000_v18 = vpop.f32.mrb[6].mxu1 }
 0x11a   :  { %v2001_v19 = vpop.f32.mrb[7].mxu1 }
 0x11b   :  { %v1503_v20 = vadd.f32 %v1999_v17, %v1463_v16 }
 0x135   :  { %v2019_v21 = vpop.f32.mrb[8].mxu0 }
 0x136   :  { %v2020_v22 = vpop.f32.mrb[9].mxu0 }
 0x137   :  { %v2021_v23 = vadd.f32 %v2020_v22, %v2019_v21  ;;  %v2022_v24 = vpop.f32.mrb[10].mxu0  ;;  %v2041_v25 = vpop.f32.mrb[8].mxu1 }
 0x138   :  { %v2023_v26 = vpop.f32.mrb[11].mxu0  ;;  %v2042_v27 = vpop.f32.mrb[9].mxu1 }
 0x139   :  { %v1543_v28 = vadd.f32 %v2021_v23, %v1503_v20  ;;  %v2043_v29 = vadd.f32 %v2042_v27, %v2041_v25  ;;  %v2044_v30 = vpop.f32.mrb[10].mxu1 }
 0x13a   :  { %v2045_v31 = vpop.f32.mrb[11].mxu1 }
 0x13b   :  { %v1583_v32 = vadd.f32 %v2043_v29, %v1543_v28 }
 0x155   :  { %v2063_v33 = vpop.f32.mrb[12].mxu0 }
 0x156   :  { %v2064_v34 = vpop.f32.mrb[13].mxu0 }
 0x157   :  { %v2065_v35 = vadd.f32 %v2064_v34, %v2063_v33  ;;  %v2066_v36 = vpop.f32.mrb[14].mxu0  ;;  %v2085_v37 = vpop.f32.mrb[12].mxu1 }
 0x158   :  { %v2067_v38 = vpop.f32.mrb[15].mxu0  ;;  %v2086_v39 = vpop.f32.mrb[13].mxu1 }
 0x159   :  { %v1623_v40 = vadd.f32 %v2065_v35, %v1583_v32  ;;  %v2087_v42 = vadd.f32 %v2086_v39, %v2085_v37  ;;  %v2088_v43 = vpop.f32.mrb[14].mxu1 }
 0x15a   :  { %v2089_v44 = vpop.f32.mrb[15].mxu1 }
 0x15b   :  { %v1663_v45 = vadd.f32 %v2087_v42, %v1623_v40 }
 0x163   :  { %v1742_v46 = vpop.f32.mrb[16].mxu1 }
 0x164   :  { %v2125_v47 = vpop.f32.mrb[17].mxu1 }
 0x165   :  { %v1745_v48 = vpop.f32.mrb[18].mxu1 }
 0x166   :  { %v2126_v49 = vpop.f32.mrb[19].mxu1 }
 0x175   :  { %v2107_v50 = vpop.f32.mrb[16].mxu0 }
 0x176   :  { %v2108_v51 = vpop.f32.mrb[17].mxu0 }
 0x177   :  { %v2109_v52 = vadd.f32 %v2108_v51, %v2107_v50  ;;  %v2110_v53 = vpop.f32.mrb[18].mxu0 }
 0x178   :  { %v2111_v54 = vpop.f32.mrb[19].mxu0 }
 0x179   :  { %v1703_v55 = vadd.f32 %v2109_v52, %v1663_v45 }
 0x17b   :  { %v1743_v41 = vadd.f32 %v1742_v46, %v1703_v55 }
 0x17d   :  { %v1748_v56 = vmax.f32 %v1743_v41, 0.0 }
 0x17f   :  { %1750 = vst.msk [vmem:[#allocation2] sm:$0x3] %vm1749_vm2, %v1748_v56 }
 0x180   :  { %2291 = shalt.err (!%p2288_p4)
}
 0x181   :  { %s2292_s19 = scalar_lea.hbm %s2822_s3, 32 }
 0x182   :  { %p2293_p5 = scmp.ne.s32.totalorder %s2822_s3, %s2292_s19  ;;  %p2296_p6 = scmp.lt.u32.totalorder %s2292_s19, %s2822_s3 }
 0x184   :  { %p2298_p7 = pnand %p2296_p6, %p2293_p5 }
 0x186   :  { %2301 = shalt.err (!%p2298_p7)
}
 0x187   :  { %1760 = dma.vmem_to_hbm [thread:$0]  %s1758_s2, 32, %s2822_s3, [#allocation3]  }
 0x188   :  { %2302 = dma.done.wait [#allocation3], 32  }
 0x189   :  { %2303 = vsyncadd [#allocation3], 4294967264 }
 0x18a   :  { %1764 = vsyncpa [#allocation3], 1 }

</bundles_post_ra>
